<compile_context>
chip_gen: v6e
topology: v6e:2x2x1
jax: 0.10.0
libtpu: 0.0.40
codegen_flags: <defaults>
</compile_context>

<pallas_src>
import functools
import math

import jax
import jax.numpy as jnp
from jax.experimental import pallas as pl
from jax.experimental.pallas import tpu as pltpu


def _masked_row_sum_kernel(x_ref, t_ref, out_ref, *, padding_idx, v_actual,
                           mask_tail, row_group):
    """out[b] += sum_{v != pad, v < V} x[b, v]   for rows with target[b] != pad, else 0.

    grid = (batch_tiles, vocab_tiles).  The (block_b, 1) output block depends only on the
    batch-tile index, so it stays resident in VMEM while vocab tiles stream through.
    """
    j = pl.program_id(1)                      # vocab-tile index (reduction axis)
    bb, bv = x_ref.shape

    @pl.when(j == 0)
    def _init():
        out_ref[...] = jnp.zeros_like(out_ref)

    # Column mask for this vocab tile: drop the padding column (model_prob == 0 there)
    # and, only for a ragged last vocab tile, the out-of-range columns whose VMEM
    # contents are unspecified.  Computed once per grid step, amortized over row groups.
    col = j * bv + jax.lax.broadcasted_iota(jnp.int32, (row_group, bv), 1)
    keep = col != padding_idx
    if mask_tail:
        keep = jnp.logical_and(keep, col < v_actual)

    zero = jnp.zeros((), x_ref.dtype)

    def body(r, carry):
        r0 = pl.multiple_of(r * row_group, row_group)
        lp = x_ref[pl.ds(r0, row_group), :]                 # (row_group, bv), native dtype
        lp = jnp.where(keep, lp, zero)                      # mask mp==0 columns pre-sum
        s = jnp.sum(lp.astype(jnp.float32), axis=-1, keepdims=True)   # (row_group, 1)
        valid = t_ref[pl.ds(r0, row_group), :] != padding_idx          # ignored rows -> 0
        rg = jnp.where(valid, s, 0.0)                        # select, never 0 * (-inf)
        out_ref[pl.ds(r0, row_group), :] += rg
        return carry

    n_groups = bb // row_group
    jax.lax.fori_loop(0, n_groups, body, 0, unroll=min(4, n_groups))


def _round_up(x, m):
    return (x + m - 1) // m * m


def _cdiv(a, b):
    return -(-a // b)


def _largest_divisor_leq(n, cap):
    cap = max(1, min(n, cap))
    for d in range(cap, 0, -1):
        if n % d == 0:
            return d
    return 1


def label_smoothing_kl_div_loss(output, target, *, label_smoothing, tgt_vocab_size,
                                ignore_index, block_b=1024, block_v=2048):
    """output: (B, V) f32/bf16 log-probs; target: (B,) int.  Returns scalar f32 loss
    equal to F.kl_div(output, smoothed_target_dist, reduction='sum')."""
    B, V = output.shape
    assert V == tgt_vocab_size
    # NOTE: PyTorch's default ignore_index=-100 only "works" by accident (negative
    # indexing into one_hot); here we require a valid in-vocab padding index.
    assert 0 <= ignore_index < V

    smoothing = float(label_smoothing) / (tgt_vocab_size - 2)
    confidence = 1.0 - float(label_smoothing)
    pad = int(ignore_index)

    target = target.astype(jnp.int32)
    valid_f = (target != pad).astype(jnp.float32)
    n_valid = jnp.sum(valid_f)

    # Target-column term (mp = confidence > 0 on valid rows): safe to pull out of the
    # kernel as an O(B) gather.  Assumes logp[b, target[b]] is finite on valid rows
    # (true for log_softmax outputs of finite logits).
    lp_tgt = jnp.take_along_axis(output, target[:, None], axis=1)[:, 0].astype(jnp.float32)
    sum_tgt = jnp.sum(valid_f * lp_tgt)

    # Entropy term sum(mp * log(mp)) is a compile-time constant per valid row.
    ent = 0.0
    if confidence > 0.0:
        ent += confidence * math.log(confidence)
    if smoothing > 0.0:
        ent += (V - 2) * smoothing * math.log(smoothing)

    if smoothing <= 0.0:
        # label_smoothing == 0: model_prob is nonzero only at the target column,
        # so the big reduction kernel is not needed at all.
        return n_valid * jnp.float32(ent) - confidence * sum_tgt

    # ---- tile selection -------------------------------------------------------------
    # Row-group / row alignment: 8 rows for 32-bit, 16 for bf16 (packed-sublane tiles).
    row_group = 8 * (4 // jnp.dtype(output.dtype).itemsize)
    # Cap the batch tile at ceil(B/2) so the "parallel" axis has >= 2 tiles (v7x megacore).
    bb = min(_round_up(block_b, row_group),
             max(row_group, _round_up(_cdiv(B, 2), row_group)))
    nb = _cdiv(B, bb)

    bv_cap = max(128, (block_v // 128) * 128)
    if V % 128 == 0:
        bv = 128 * _largest_divisor_leq(V // 128, bv_cap // 128)
        if bv * 4 < bv_cap and V > bv_cap:
            bv = bv_cap          # poor divisor structure: prefer big ragged tiles + mask
    else:
        bv = min(bv_cap, _round_up(V, 128))
    nv = _cdiv(V, bv)
    mask_tail = (V % bv) != 0    # ragged last vocab tile -> mask garbage columns in-kernel

    # Only the tiny target vector is padded; rows past B get target == pad -> contribute 0.
    tgt2d = jnp.pad(target, (0, nb * bb - B), constant_values=pad).reshape(nb * bb, 1)

    kernel = functools.partial(
        _masked_row_sum_kernel,
        padding_idx=pad, v_actual=V, mask_tail=mask_tail, row_group=row_group)

    itemsize = jnp.dtype(output.dtype).itemsize
    vmem_bytes = (2 * bb * bv * itemsize     # double-buffered log-prob tiles
                  + 2 * bb * 512             # double-buffered target blocks (lane-padded)
                  + 2 * bb * 512             # resident (block_b, 1) output partials
                  + (4 << 20))               # headroom
    vmem_bytes = int(min(vmem_bytes, 100 << 20))   # defaults stay ~22 MiB (v7x-safe)

    partials = pl.pallas_call(
        kernel,
        out_shape=jax.ShapeDtypeStruct((nb * bb, 1), jnp.float32),
        grid_spec=pltpu.PrefetchScalarGridSpec(
            num_scalar_prefetch=0,
            grid=(nb, nv),
            in_specs=[
                pl.BlockSpec((bb, bv), lambda i, j: (i, j)),   # log-prob tile
                pl.BlockSpec((bb, 1), lambda i, j: (i, 0)),    # target ids (resident over j)
            ],
            out_specs=pl.BlockSpec((bb, 1), lambda i, j: (i, 0)),  # resident over j
        ),
        compiler_params=pltpu.CompilerParams(
            dimension_semantics=("parallel", "arbitrary"),
            vmem_limit_bytes=vmem_bytes,
        ),
    )(output, tgt2d)

    kernel_sum = jnp.sum(partials)   # = sum_{valid b} sum_{v != pad, v < V} logp[b, v]
    cross = smoothing * kernel_sum + (confidence - smoothing) * sum_tgt
    return n_valid * jnp.float32(ent) - cross


def _reference_loss(output, target, *, label_smoothing, tgt_vocab_size, ignore_index):
    """Pure-JAX replica of the PyTorch forward, for verification."""
    B, V = output.shape
    smoothing_value = label_smoothing / (tgt_vocab_size - 2)
    confidence = 1.0 - label_smoothing
    col = jnp.arange(V)[None, :]
    tgt = target[:, None]
    mp = jnp.where(col == ignore_index, 0.0, smoothing_value)
    mp = jnp.broadcast_to(mp, (B, V))
    mp = jnp.where(col == tgt, confidence, mp)
    mp = jnp.where(tgt == ignore_index, 0.0, mp)
    pos = mp > 0.0
    term = jnp.where(pos, mp * (jnp.log(jnp.where(pos, mp, 1.0)) - output.astype(jnp.float32)), 0.0)
    return jnp.sum(term)


if __name__ == "__main__":
    key = jax.random.PRNGKey(0)

    # Case 1: aligned shapes; small tiles forced so the 2-D grid (4 x 4), the resident
    # per-batch-tile accumulator across vocab tiles, and the parallel batch axis are
    # all exercised.
    B1, V1, pad1, ls1 = 64, 1024, 1, 0.1
    k1, k2, key = jax.random.split(key, 3)
    logits1 = jax.random.normal(k1, (B1, V1), dtype=jnp.float32)
    out1 = jax.nn.log_softmax(logits1, axis=-1)          # F.kl_div expects log-probs
    tgt1 = jax.random.randint(k2, (B1,), 0, V1, dtype=jnp.int32)
    tgt1 = tgt1.at[0].set(pad1).at[7].set(pad1)          # include ignored rows
    loss1 = label_smoothing_kl_div_loss(
        out1, tgt1, label_smoothing=ls1, tgt_vocab_size=V1, ignore_index=pad1,
        block_b=16, block_v=256)
    loss1 = jax.block_until_ready(loss1)
    ref1 = _reference_loss(out1, tgt1, label_smoothing=ls1, tgt_vocab_size=V1,
                           ignore_index=pad1)
    assert jnp.allclose(loss1, ref1, rtol=1e-4, atol=1e-3), (loss1, ref1)

    # Case 2: unaligned batch and vocab with default tiles -> exercises the cdiv grid
    # with ragged batch rows and ragged vocab-tail masking (no jnp.pad of the big array).
    B2, V2, pad2, ls2 = 13, 300, 2, 0.1
    k3, k4, key = jax.random.split(key, 3)
    logits2 = jax.random.normal(k3, (B2, V2), dtype=jnp.float32)
    out2 = jax.nn.log_softmax(logits2, axis=-1)
    tgt2 = jax.random.randint(k4, (B2,), 0, V2, dtype=jnp.int32)
    tgt2 = tgt2.at[3].set(pad2)
    loss2 = label_smoothing_kl_div_loss(
        out2, tgt2, label_smoothing=ls2, tgt_vocab_size=V2, ignore_index=pad2)
    loss2 = jax.block_until_ready(loss2)
    ref2 = _reference_loss(out2, tgt2, label_smoothing=ls2, tgt_vocab_size=V2,
                           ignore_index=pad2)
    assert jnp.allclose(loss2, ref2, rtol=1e-4, atol=1e-3), (loss2, ref2)

    # Case 3: bf16 log-probs (16-row packed-sublane row groups, native bf16 select).
    B3, V3, pad3, ls3 = 32, 512, 0, 0.2
    k5, k6, key = jax.random.split(key, 3)
    logits3 = jax.random.normal(k5, (B3, V3), dtype=jnp.float32)
    out3 = jax.nn.log_softmax(logits3, axis=-1).astype(jnp.bfloat16)
    tgt3 = jax.random.randint(k6, (B3,), 0, V3, dtype=jnp.int32)
    tgt3 = tgt3.at[5].set(pad3)
    loss3 = label_smoothing_kl_div_loss(
        out3, tgt3, label_smoothing=ls3, tgt_vocab_size=V3, ignore_index=pad3)
    loss3 = jax.block_until_ready(loss3)
    ref3 = _reference_loss(out3, tgt3, label_smoothing=ls3, tgt_vocab_size=V3,
                           ignore_index=pad3)
    assert jnp.allclose(loss3, ref3, rtol=2e-3, atol=2e-2), (loss3, ref3)

    print("KERNEL_OK")
</pallas_src>

<mosaic_0001>
module attributes {stable_mosaic.version = 11 : i64} {
  func.func @_masked_row_sum_kernel(%arg0: i32, %arg1: i32, %arg2: memref<16x256xf32, #tpu.memory_space<vmem>>, %arg3: memref<16x1xi32, #tpu.memory_space<vmem>>, %arg4: memref<16x1xf32, #tpu.memory_space<vmem>>) attributes {dimension_semantics = [#tpu.dimension_semantics<parallel>, #tpu.dimension_semantics<arbitrary>], iteration_bounds = array<i64: 4, 4>, scalar_prefetch = 0 : i64, scratch_operands = 0 : i64, tpu.core_type = #tpu.core_type<tc>, window_params = [{transform_indices = @transform_0, window_bounds = array<i64: 16, 256>}, {transform_indices = @transform_1, window_bounds = array<i64: 16, 1>}, {transform_indices = @transform_2, window_bounds = array<i64: 16, 1>}]} {
    %c0_i32 = arith.constant 0 : i32
    %0 = arith.cmpi eq, %arg1, %c0_i32 : i32
    %1 = arith.extui %0 : i1 to i32
    %c0_i32_0 = arith.constant 0 : i32
    %2 = arith.cmpi ne, %1, %c0_i32_0 : i32
    scf.if %2 {
      %cst_17 = arith.constant 0.000000e+00 : f32
      %47 = vector.broadcast %cst_17 : f32 to vector<16x1xf32>
      %c0_18 = arith.constant 0 : index
      %c0_19 = arith.constant 0 : index
      %48 = vector.load %arg4[%c0_18, %c0_19] : memref<16x1xf32, #tpu.memory_space<vmem>>, vector<16x1xf32>
      tpu.vector_store %arg4[%c0_18, %c0_19], %47 {strides = array<i32>} : memref<16x1xf32, #tpu.memory_space<vmem>>, vector<16x1xf32>,
    } else {
    }
    %c256_i32 = arith.constant 256 : i32
    %3 = arith.muli %arg1, %c256_i32 : i32
    %4 = tpu.iota {dimensions = array<i32: 1>} : vector<8x256xi32>
    %5 = vector.broadcast %3 : i32 to vector<8x256xi32>
    %6 = arith.addi %5, %4 : vector<8x256xi32>
    %c1_i32 = arith.constant 1 : i32
    %7 = vector.broadcast %c1_i32 : i32 to vector<8x256xi32>
    %8 = arith.cmpi ne, %6, %7 : vector<8x256xi32>
    %cst = arith.constant 0.000000e+00 : f32
    %c0_i32_1 = arith.constant 0 : i32
    %c8_i32 = arith.constant 8 : i32
    %9 = arith.muli %c0_i32_1, %c8_i32 : i32
    %10 = tpu.assume_multiple %9, 8 : i32
    %11 = arith.index_cast %10 : i32 to index
    %c0 = arith.constant 0 : index
    %12 = vector.load %arg2[%11, %c0] : memref<16x256xf32, #tpu.memory_space<vmem>>, vector<8x256xf32>
    %13 = vector.broadcast %cst : f32 to vector<8x256xf32>
    %14 = arith.select %8, %12, %13 : vector<8x256xi1>, vector<8x256xf32>
    %cst_2 = arith.constant dense<0.000000e+00> : vector<8xf32>
    %15 = vector.multi_reduction <add>, %14, %cst_2 [1] : vector<8x256xf32> to vector<8xf32>
    %16 = vector.shape_cast %15 : vector<8xf32> to vector<8x1xf32>
    %17 = arith.index_cast %10 : i32 to index
    %c0_3 = arith.constant 0 : index
    %18 = vector.load %arg3[%17, %c0_3] : memref<16x1xi32, #tpu.memory_space<vmem>>, vector<8x1xi32>
    %c1_i32_4 = arith.constant 1 : i32
    %19 = vector.broadcast %c1_i32_4 : i32 to vector<8x1xi32>
    %20 = arith.cmpi ne, %18, %19 : vector<8x1xi32>
    %cst_5 = arith.constant 0.000000e+00 : f32
    %21 = vector.broadcast %cst_5 : f32 to vector<8x1xf32>
    %22 = arith.select %20, %16, %21 : vector<8x1xi1>, vector<8x1xf32>
    %23 = arith.index_cast %10 : i32 to index
    %c0_6 = arith.constant 0 : index
    %24 = vector.load %arg4[%23, %c0_6] : memref<16x1xf32, #tpu.memory_space<vmem>>, vector<8x1xf32>
    %25 = arith.addf %24, %22 : vector<8x1xf32>
    %26 = arith.index_cast %10 : i32 to index
    %c0_7 = arith.constant 0 : index
    %27 = vector.load %arg4[%26, %c0_7] : memref<16x1xf32, #tpu.memory_space<vmem>>, vector<8x1xf32>
    tpu.vector_store %arg4[%26, %c0_7], %25 {strides = array<i32>} : memref<16x1xf32, #tpu.memory_space<vmem>>, vector<8x1xf32>,
    %c1_i32_8 = arith.constant 1 : i32
    %c8_i32_9 = arith.constant 8 : i32
    %28 = arith.muli %c1_i32_8, %c8_i32_9 : i32
    %29 = tpu.assume_multiple %28, 8 : i32
    %30 = arith.index_cast %29 : i32 to index
    %c0_10 = arith.constant 0 : index
    %31 = vector.load %arg2[%30, %c0_10] : memref<16x256xf32, #tpu.memory_space<vmem>>, vector<8x256xf32>
    %32 = vector.broadcast %cst : f32 to vector<8x256xf32>
    %33 = arith.select %8, %31, %32 : vector<8x256xi1>, vector<8x256xf32>
    %cst_11 = arith.constant dense<0.000000e+00> : vector<8xf32>
    %34 = vector.multi_reduction <add>, %33, %cst_11 [1] : vector<8x256xf32> to vector<8xf32>
    %35 = vector.shape_cast %34 : vector<8xf32> to vector<8x1xf32>
    %36 = arith.index_cast %29 : i32 to index
    %c0_12 = arith.constant 0 : index
    %37 = vector.load %arg3[%36, %c0_12] : memref<16x1xi32, #tpu.memory_space<vmem>>, vector<8x1xi32>
    %c1_i32_13 = arith.constant 1 : i32
    %38 = vector.broadcast %c1_i32_13 : i32 to vector<8x1xi32>
    %39 = arith.cmpi ne, %37, %38 : vector<8x1xi32>
    %cst_14 = arith.constant 0.000000e+00 : f32
    %40 = vector.broadcast %cst_14 : f32 to vector<8x1xf32>
    %41 = arith.select %39, %35, %40 : vector<8x1xi1>, vector<8x1xf32>
    %42 = arith.index_cast %29 : i32 to index
    %c0_15 = arith.constant 0 : index
    %43 = vector.load %arg4[%42, %c0_15] : memref<16x1xf32, #tpu.memory_space<vmem>>, vector<8x1xf32>
    %44 = arith.addf %43, %41 : vector<8x1xf32>
    %45 = arith.index_cast %29 : i32 to index
    %c0_16 = arith.constant 0 : index
    %46 = vector.load %arg4[%45, %c0_16] : memref<16x1xf32, #tpu.memory_space<vmem>>, vector<8x1xf32>
    tpu.vector_store %arg4[%45, %c0_16], %44 {strides = array<i32>} : memref<16x1xf32, #tpu.memory_space<vmem>>, vector<8x1xf32>,
    %c2_i32 = arith.constant 2 : i32
    return
  }
  func.func @transform_0(%arg0: i32, %arg1: i32) -> (i32, i32) {
    %c0_i32 = arith.constant 0 : i32
    return %arg0, %arg1 : i32, i32
  }
  func.func @transform_1(%arg0: i32, %arg1: i32) -> (i32, i32) {
    %c0_i32 = arith.constant 0 : i32
    %c0_i32_0 = arith.constant 0 : i32
    return %arg0, %c0_i32 : i32, i32
  }
  func.func @transform_2(%arg0: i32, %arg1: i32) -> (i32, i32) {
    %c0_i32 = arith.constant 0 : i32
    %c0_i32_0 = arith.constant 0 : i32
    return %arg0, %c0_i32 : i32, i32
  }
}

</mosaic_0001>

<bundles_post_ra>
// kernel: tpu_custom_call.1
= control target key start
LH: loop header
LB: loop body
LE: loop exit
PB: predicated region body
PF: predicated region fallthrough
CT: control target
= control target key end

     0   :  { %7 = vsyncpa [#allocation3], 0  ;;  %s705_s0 = inlined_call_operand.hbm [shape: f32[64,1024], index: 0, kind: input, shape index: {}]   ;;  %s706_s1 = inlined_call_operand.vmem [shape: s32[64,1], index: 1, kind: input, shape index: {}]   ;;  %s707_s2 = inlined_call_operand.vmem [shape: f32[64,1], index: 2, kind: output, shape index: {}]  }
   0x1   :  { %9 = vsyncpa [#allocation3 + $0x1], 0  ;;  %s568_s9 = smov 0   ;;  %s570_s10 = smov 0  }
   0x2   :  { %s572_s11 = smov 0   ;;  %s574_s12 = smov 0  }
   0x3   :  { %s576_s13 = smov 0   ;;  %s578_s14 = smov 0  }
   0x4   :  { %s580_s15 = smov 0   ;;  %s582_s16 = smov 0  }
   0x5 LB: > { %s352_s17 = sadd.s32 4294967295, %s546_s16   ;;  %s24_s18 = sadd.s32 1, %s538_s14  ;;  %s546_s16 = sphi %s582_s16, %s15_s16   ;;  %s542_s15 = sphi %s580_s15, %s717_s15   ;;  %s538_s14 = sphi %s578_s14, %s716_s14   ;;  %s534_s13 = sphi %s576_s13, %s715_s13   ;;  %s530_s12 = sphi %s574_s12, %s714_s12   ;;  %s526_s11 = sphi %s572_s11, %s713_s11   ;;  %s522_s10 = sphi %s570_s10, %s712_s10   ;;  %s518_s9 = sphi %s568_s9, %s711_s9  }
   0x6   : > { %p25_p0 = scmp.ge.s32.totalorder %s24_s18, 4  ;;  %s27_s19 = sadd.s32 1, %s542_s15 }
   0x7   : > { %s36_s20 = sadd.s32 1, %s526_s11  ;;  %p43_p1 = scmp.ne.s32.totalorder %s526_s11, %s522_s10 }
   0x8   : > { %s719_s18 = smov (%p25_p0, %s24_s18), 0  ;;  %s721_s19 = smov (!%p25_p0, %s27_s19), %s542_s15 }
   0x9   : > { %s32_s21 = ssub.s32 %s538_s14, %s719_s18  ;;  %p44_p2 = scmp.eq.s32.totalorder %s546_s16, 0 }
   0xa   : > { %p29_p3 = scmp.ge.s32.totalorder %s721_s19, 4  ;;  %p49_p4 = scmp.ne.s32.totalorder %s522_s10, %s518_s9 }
   0xb   : > { %p619_p5 = por %p44_p2, %p43_p1  ;;  %p50_p6 = scmp.eq.s32.totalorder %s352_s17, 0 }
   0xc   : > { %s723_s19 = smov (%p29_p3, %s721_s19), 0  ;;  %p383_p8 = scmp.lt.s32.totalorder %s546_s16, 16 }
   0xd   : > { %p625_p7 = por %p50_p6, %p49_p4  ;;  %s31_s24 = ssub.s32 %s542_s15, %s723_s19 }
   0xe   : > { %s33_s25 = sor.u32 %s32_s21, %s31_s24  ;;  %s125_s26 = sand.u32 1, %s526_s11  }
   0xf   : > { %p34_p9 = scmp.eq.s32.totalorder %s33_s25, 0  ;;  %s356_s27 = sshll.u32 %s125_s26, 5 }
  0x10   : > { %s358_s28 = sshll.u32 %s538_s14, 1  ;;  %s376_s30 = sshll.u32 %s542_s15, 4 }
  0x11   : > { %s635_s29 = scalar_select %p34_p9, %s526_s11, %s36_s20  }
  0x12   : > { %s136_s3 = sadd.s32 %s376_s30, %s358_s28  ;;  %s129_s4 = scalar_lea.vmem [#allocation2], %s356_s27 }
  0x13   : > { %s139_s5 = sshll.u32 %s129_s4, 4  ;;  %s360_s6 = sshll.u32 %s136_s3, 7  ;;  %s140_s5 = int_to_ptr.vmem [resolvable:$true] %s139_s5 }
  0x14   : > { %s138_s9 = scalar_lea.hbm %s705_s0, %s360_s6  ;;  %p645_p10 = pnand %p383_p8, %p619_p5 }
  0x15   : > { %s126_s21 = scalar_lea.sflag [#allocation3], %s125_s26  ;;  %s465_s20 = scalar_lea.vmem %s140_s5, 512 }
  0x16   : > { %p454_p11 = pneg %p645_p10  ;;  %p466_p12 = scmp.ne.s32.totalorder %s140_s5, %s465_s20 }
  0x17   : > { %s548_s24 = smov [#allocation2]  }
  0x18   : > { %p468_p13 = pnand %p466_p12, %p454_p11  ;;  %s470_s25 = sshll.u32 %s548_s24, 4  ;;  %s471_s25 = int_to_ptr.vmem [resolvable:$false] %s470_s25 }
  0x19   : > { %s472_s27 = scalar_lea.vmem %s471_s25, 1024  ;;  %p473_p1 = scmp.lt.s32.totalorder %s140_s5, %s471_s25 }
  0x1a   : > { %p469_p0 = pneg %p468_p13  ;;  %p474_p2 = scmp.lt.s32.totalorder %s472_s27, %s465_s20 }
  0x1c   : > { %p475_p3 = por %p474_p2, %p473_p1 }
  0x1e   : > { %p476_p4 = pnand %p475_p3, %p469_p0 }
  0x20   : > { %479 = shalt.err (!%p476_p4)
}
  0x21   : > { %s549_s22 = smov 1024   ;;  %s550_s26 = smov 256  }
  0x22   : > { %s551_s28 = smov 16   ;;  %p361_p5 = scmp.ge.s32.totalorder %s546_s16, 1 }
  0x23   : > { %382 = dma.hbm_to_vmem [thread:$0]  (!%p645_p10), %s138_s9, 512, %s140_s5, %s126_s21, %s549_s22, %s550_s26, %s551_s28  }
  0x24   : > { %p156_p6 = scmp.lt.s32.totalorder %s546_s16, 17 }
  0x26   : > { %p157_p8 = pnand %p361_p5, %p156_p6 }
  0x27   : > { %s162_s30 = sand.u32 (!%p157_p8), 1, %s522_s10  }
  0x28   : > { %160 = sbr.rel (%p157_p8) target bundleno = 213 (0xd5), region = 28  ;;  %s362_s3 = sshll.u32 (!%p157_p8), %s162_s30, 5 }
  0x29   : > { %s163_s4 = scalar_lea.sflag (!%p157_p8), [#allocation3], %s162_s30  ;;  %s166_s6 = scalar_lea.vmem (!%p157_p8), [#allocation2], %s362_s3 }
  0x2d   : > { %513 = dma.done.wait (%p625_p7), %s163_s4, 512  }
  0x2e   : > { %515 = vsyncadd (%p625_p7), %s163_s4, 4294966784  ;;  %s363_s7 = sshll.u32 %s534_s13, 1  ;;  %p367_p10 = scmp.ne.s32.totalorder %s530_s12, 0 }
  0x2f   : > { %p195_p9 = scmp.lt.s32.totalorder %s363_s7, 7 }
  0x30   : > { %209 = sbr.rel (%p367_p10) target bundleno = 55 (0x37), region = 36 }
  0x31   : > { %s725_s7 = smov (!%p195_p9, %s363_s7), 7 }
  0x32   : > { %s364_s5 = sshll.u32 %s725_s7, 3 }
  0x33   : > { %s664_s17 = scalar_lea.vmem %s706_s1, %s364_s5  ;;  %s669_s24 = scalar_lea.vmem %s707_s2, %s364_s5 }
  0x35   : > { %vm210_vm0 = vcmask 7168   ;;  %v552_v0 = vmov 0.0  }
  0x36   : > { %211 = vst.msk [vmem:[%s669_s24] sm:$0xff] %vm210_vm0, %v552_v0  ;;  %212 = vst.msk [vmem:[%s669_s24 + $0x8] sm:$0xff] %vm210_vm0, %v552_v0 }
  0x37 PF: > { %s368_s13 = sshll.u32 %s530_s12, 8  ;;  %v214_v1 = vlaneseq  ;;  %v225_v6 = vld [vmem:[%s166_s6] sm:$0xff]  ;;  %v226_v8 = vld [vmem:[%s166_s6 + $0x8] sm:$0xff]  ;;  %v369_v9 = vld [vmem:[%s166_s6 + $0x10] sm:$0xff]  ;;  %vm237_vm4 = vcmask 7168  }
  0x38   : > { %v217_v2 = vstv %s368_s13  ;;  %v370_v10 = vld [vmem:[%s166_s6 + $0x18] sm:$0xff]  ;;  %v232_v17 = vld [vmem:[%s664_s17] sm:$0xff]  ;;  %v371_v22 = vld [vmem:[%s664_s17 + $0x8] sm:$0xff] }
  0x39   : > { %v215_v3 = vand.u32 127, %v214_v1  ;;  %vm233_vm3 = vcmp.ne.s32.totalorder %v232_v17, 1  ;;  %vm251_vm5 = vcmp.ne.s32.totalorder %v371_v22, 1 }
  0x3b   : > { %v216_v4 = vadd.s32 128, %v215_v3  ;;  %v218_v5 = vadd.s32 %v217_v2, %v215_v3 }
  0x3d   : > { %v219_v7 = vadd.s32 %v217_v2, %v216_v4  ;;  %vm220_vm1 = vcmp.ne.s32.totalorder %v218_v5, 1  ;;  %v235_v18 = vld [vmem:[%s669_s24] sm:$0xff]  ;;  %v372_v25 = vld [vmem:[%s669_s24 + $0x8] sm:$0xff] }
  0x3e   : > { %v227_v11 = vsel %vm220_vm1, %v225_v6, 0.0  ;;  %v244_v13 = vsel %vm220_vm1, %v369_v9, 0.0 }
  0x3f   : > { %vm221_vm2 = vcmp.ne.s32.totalorder %v219_v7, 1 }
  0x40   : > { %v228_v12 = vsel %vm221_vm2, %v226_v8, 0.0  ;;  %v245_v14 = vsel %vm221_vm2, %v370_v10, 0.0 }
  0x41   : > { %v229_v15 = vadd.f32 %v228_v12, %v227_v11  ;;  %v246_v16 = vadd.f32 %v245_v14, %v244_v13 }
  0x43   : > { %230 = vadd.xlane.f32.xlu0 %v229_v15 }
  0x47   : > { %247 = vadd.xlane.f32.xlu0 %v246_v16 }
  0xcc   : > { %v231_v19 = vpop.xlane.xlu0 %230 }
  0xcd   : > { %v234_v20 = vsel %vm233_vm3, %v231_v19, 0.0 }
  0xce   : > { %v236_v21 = vadd.f32 %v235_v18, %v234_v20 }
  0xd0   : > { %238 = vst.msk [vmem:[%s669_s24] sm:$0xff] %vm237_vm4, %v236_v21  ;;  %v248_v23 = vpop.xlane.xlu0 %247 }
  0xd1   : > { %v252_v24 = vsel %vm251_vm5, %v248_v23, 0.0 }
  0xd2   : > { %v255_v26 = vadd.f32 %v372_v25, %v252_v24 }
  0xd4   : > { %373 = vst.msk [vmem:[%s669_s24 + $0x8] sm:$0xff] %vm237_vm4, %v255_v26 }
  0xd5 PF: > { %s15_s16 = sadd.s32 1, %s546_s16   ;;  %s711_s9 = smov %s522_s10 }
  0xd6   : > { %p12_p7 = scmp.ge.s32.totalorder %s15_s16, 18   ;;  %s712_s10 = smov %s526_s11 }
  0xd7   : > { %s713_s11 = smov %s635_s29  ;;  %s714_s12 = smov %s538_s14 }
  0xd8   : > { %s715_s13 = smov %s542_s15  ;;  %s716_s14 = smov %s719_s18 }
  0xd9   : > { %s717_s15 = smov %s723_s19  ;;  %14 = sbr.rel (!%p12_p7) target bundleno = 5 (0x5), region = 79 }
  0xde   :  { %279 = vsyncpa [#allocation3], 1 }
  0xdf   :  { %281 = vsyncpa [#allocation3 + $0x1], 1 }

</bundles_post_ra>
